<compile_context>
chip_gen: v7x
topology: tpu7x:2x2x1
jax: 0.10.0
libtpu: 0.0.40
codegen_flags: <defaults>
</compile_context>

<pallas_src>
import jax
import jax.numpy as jnp
from jax import lax
from jax.experimental import pallas as pl
from jax.experimental.pallas import tpu as pltpu


def _sigmoid(x):
    # Exactly sigmoid(x): one EUP op (tanh) instead of exp + reciprocal.
    return 0.5 * jnp.tanh(0.5 * x) + 0.5


def _mlp_kernel(w12_ref, b12_ref, w3_ref, b3_ref, w4_ref, b4_ref, x_ref, o_ref):
    """Fused MLP forward on one (tb, 12) batch tile; activations kept (feat, tb)."""
    x = x_ref[...]                                       # (tb, 12) f32, batch on sublanes

    # (6,12) x (tb,12)^T -> (6,tb): fold the x transpose into the MXU operand so
    # the batch dimension lands on the 128-lane axis for everything downstream.
    h = lax.dot_general(
        w12_ref[...], x,
        dimension_numbers=(((1,), (1,)), ((), ())),
        preferred_element_type=jnp.float32) + b12_ref[...]          # (6, tb)
    h = _sigmoid(h)
    h = jnp.dot(w3_ref[...], h, preferred_element_type=jnp.float32) + b3_ref[...]   # (6, tb)
    h = _sigmoid(h)
    y = jnp.dot(w4_ref[...], h, preferred_element_type=jnp.float32) + b4_ref[...]   # (out, tb)
    o_ref[...] = _sigmoid(y).astype(o_ref.dtype)


def _ceil_to(v, m):
    return ((v + m - 1) // m) * m


def linear_model_forward(x, params, *, block_rows=65536, xla_fallback_rows=16384,
                         vmem_limit_bytes=None):
    """x: (B, 12) float32. params: dict of (w, b) per layer, w stored (in, out)."""
    (w1, b1), (w2, b2), (w3, b3), (w4, b4) = (
        params["input"], params["hidden_1"], params["hidden_2"], params["output"])
    out_dim = w4.shape[1]
    B = x.shape[0]

    # Tiny batches: the fused XLA forward is strictly cheaper than any pallas_call.
    if B < xla_fallback_rows:
        return reference_forward(x, params)

    # Fold Linear(12->8) . Linear(8->6): no nonlinearity between them in the spec.
    w12 = (w1 @ w2).astype(jnp.float32)                  # (12, 6)
    b12 = (b1 @ w2 + b2).astype(jnp.float32)             # (1, 6)

    # Transposed weights / column biases (feature axis on sublanes).
    w12t, b12t = w12.T, b12.T                            # (6, 12), (6, 1)
    w3t, b3t = w3.T.astype(jnp.float32), b3.T.astype(jnp.float32)    # (6, 6), (6, 1)
    w4t, b4t = w4.T.astype(jnp.float32), b4.T.astype(jnp.float32)    # (out, 6), (out, 1)

    x32 = x.astype(jnp.float32)

    # Batch-tile sizing: biggest lane-aligned tile <= block_rows, with >=2 grid
    # steps when the batch is large enough (so v7x megacore splits across TCs).
    if B <= 256:
        tb = B                                           # single full-array tile
    else:
        tb = min(block_rows, _ceil_to(B, 128))
        if pl.cdiv(B, tb) < 2:
            tb = _ceil_to(pl.cdiv(B, 2), 128)
    grid_n = pl.cdiv(B, tb)

    const = lambda i: (0, 0)
    yt = pl.pallas_call(
        _mlp_kernel,
        out_shape=jax.ShapeDtypeStruct((out_dim, B), jnp.float32),
        grid=(grid_n,),
        in_specs=[
            pl.BlockSpec(w12t.shape, const),             # resident params (one DMA each)
            pl.BlockSpec(b12t.shape, const),
            pl.BlockSpec(w3t.shape, const),
            pl.BlockSpec(b3t.shape, const),
            pl.BlockSpec(w4t.shape, const),
            pl.BlockSpec(b4t.shape, const),
            pl.BlockSpec((tb, 12), lambda i: (i, 0)),    # pipelined native batch tile
        ],
        out_specs=pl.BlockSpec((out_dim, tb), lambda i: (0, i)),     # lane-dense output
        compiler_params=pltpu.CompilerParams(
            dimension_semantics=("parallel",),           # megacore split on v7x
            vmem_limit_bytes=vmem_limit_bytes),
    )(w12t, b12t, w3t, b3t, w4t, b4t, x32)

    return yt.T                                          # tiny (out, B) -> (B, out)


def init_params(key, out=4):
    """Deterministic init mimicking torch.nn.Linear default (U(-1/sqrt(fan_in), +))."""
    dims = [("input", 12, 8), ("hidden_1", 8, 6), ("hidden_2", 6, 6), ("output", 6, out)]
    params = {}
    for name, fan_in, fan_out in dims:
        key, kw, kb = jax.random.split(key, 3)
        bound = 1.0 / jnp.sqrt(float(fan_in))
        # Stored already transposed to (in, out) for the y = x @ W layout.
        w = jax.random.uniform(kw, (fan_in, fan_out), jnp.float32, -bound, bound)
        b = jax.random.uniform(kb, (1, fan_out), jnp.float32, -bound, bound)
        params[name] = (w, b)
    return params


def reference_forward(x, params):
    """Unfused 4-layer chain, exactly matching the PyTorch forward."""
    (w1, b1), (w2, b2), (w3, b3), (w4, b4) = (
        params["input"], params["hidden_1"], params["hidden_2"], params["output"])
    h = x @ w1 + b1
    h = h @ w2 + b2
    h = jax.nn.sigmoid(h)
    h = h @ w3 + b3
    h = jax.nn.sigmoid(h)
    h = h @ w4 + b4
    return jax.nn.sigmoid(h)


if __name__ == "__main__":
    key = jax.random.PRNGKey(0)
    key, kx = jax.random.split(key)
    B, OUT = 8, 4
    x = jax.random.normal(kx, (B, 12), jnp.float32)
    params = init_params(key, out=OUT)

    # Small batch, single full-array tile; force the Pallas kernel path.
    y = jax.block_until_ready(linear_model_forward(x, params, xla_fallback_rows=0))
    y_ref = reference_forward(x, params)
    assert y.shape == (B, OUT), y.shape
    assert jnp.allclose(y, y_ref, atol=1e-5), float(jnp.max(jnp.abs(y - y_ref)))

    # Multi-step pipelined grid with a ragged last block (1000 rows -> 512 + 488).
    x2 = jax.random.normal(jax.random.PRNGKey(1), (1000, 12), jnp.float32)
    y2 = jax.block_until_ready(linear_model_forward(x2, params, xla_fallback_rows=0))
    y2_ref = reference_forward(x2, params)
    assert y2.shape == (1000, OUT), y2.shape
    assert jnp.allclose(y2, y2_ref, atol=1e-5), float(jnp.max(jnp.abs(y2 - y2_ref)))

    # Default small-batch dispatch (fused-XLA path) also matches.
    y3 = jax.block_until_ready(linear_model_forward(x, params))
    assert jnp.allclose(y3, y_ref, atol=1e-6)

    print("KERNEL_OK")
</pallas_src>

<mosaic_0001>
module attributes {stable_mosaic.version = 11 : i64} {
  func.func @_mlp_kernel(%arg0: i32, %arg1: memref<6x12xf32, #tpu.memory_space<vmem>>, %arg2: memref<6x1xf32, #tpu.memory_space<vmem>>, %arg3: memref<6x6xf32, #tpu.memory_space<vmem>>, %arg4: memref<6x1xf32, #tpu.memory_space<vmem>>, %arg5: memref<4x6xf32, #tpu.memory_space<vmem>>, %arg6: memref<4x1xf32, #tpu.memory_space<vmem>>, %arg7: memref<8x12xf32, #tpu.memory_space<vmem>>, %arg8: memref<4x8xf32, #tpu.memory_space<vmem>>) attributes {dimension_semantics = [#tpu.dimension_semantics<parallel>], iteration_bounds = array<i64: 1>, scalar_prefetch = 0 : i64, scratch_operands = 0 : i64, tpu.core_type = #tpu.core_type<tc>, window_params = [{pipeline_mode = #tpu.pipeline_mode<synchronous>, transform_indices = @transform_0, window_bounds = array<i64: 6, 12>}, {pipeline_mode = #tpu.pipeline_mode<synchronous>, transform_indices = @transform_1, window_bounds = array<i64: 6, 1>}, {pipeline_mode = #tpu.pipeline_mode<synchronous>, transform_indices = @transform_2, window_bounds = array<i64: 6, 6>}, {pipeline_mode = #tpu.pipeline_mode<synchronous>, transform_indices = @transform_3, window_bounds = array<i64: 6, 1>}, {pipeline_mode = #tpu.pipeline_mode<synchronous>, transform_indices = @transform_4, window_bounds = array<i64: 4, 6>}, {pipeline_mode = #tpu.pipeline_mode<synchronous>, transform_indices = @transform_5, window_bounds = array<i64: 4, 1>}, {transform_indices = @transform_6, window_bounds = array<i64: 8, 12>}, {transform_indices = @transform_7, window_bounds = array<i64: 4, 8>}]} {
    %c0 = arith.constant 0 : index
    %c0_0 = arith.constant 0 : index
    %0 = vector.load %arg7[%c0, %c0_0] : memref<8x12xf32, #tpu.memory_space<vmem>>, vector<8x12xf32>
    %c0_1 = arith.constant 0 : index
    %c0_2 = arith.constant 0 : index
    %1 = vector.load %arg1[%c0_1, %c0_2] : memref<6x12xf32, #tpu.memory_space<vmem>>, vector<6x12xf32>
    %cst = arith.constant dense<0.000000e+00> : vector<6x8xf32>
    %2 = tpu.matmul %1, %0, %cst {dimension_numbers = #tpu.dot_dimension_numbers<[1], [1], [0], [0], [0, 0, 1, 0], [], []>} : vector<6x12xf32>, vector<8x12xf32>, vector<6x8xf32> -> vector<6x8xf32>
    %c0_3 = arith.constant 0 : index
    %c0_4 = arith.constant 0 : index
    %3 = vector.load %arg2[%c0_3, %c0_4] : memref<6x1xf32, #tpu.memory_space<vmem>>, vector<6x1xf32>
    %4 = vector.broadcast %3 : vector<6x1xf32> to vector<6x8xf32>
    %5 = arith.addf %2, %4 : vector<6x8xf32>
    %cst_5 = arith.constant 5.000000e-01 : f32
    %6 = vector.broadcast %cst_5 : f32 to vector<6x8xf32>
    %7 = arith.mulf %6, %5 : vector<6x8xf32>
    %8 = math.tanh %7 : vector<6x8xf32>
    %cst_6 = arith.constant 5.000000e-01 : f32
    %9 = vector.broadcast %cst_6 : f32 to vector<6x8xf32>
    %10 = arith.mulf %9, %8 : vector<6x8xf32>
    %cst_7 = arith.constant 5.000000e-01 : f32
    %11 = vector.broadcast %cst_7 : f32 to vector<6x8xf32>
    %12 = arith.addf %10, %11 : vector<6x8xf32>
    %c0_8 = arith.constant 0 : index
    %c0_9 = arith.constant 0 : index
    %13 = vector.load %arg3[%c0_8, %c0_9] : memref<6x6xf32, #tpu.memory_space<vmem>>, vector<6x6xf32>
    %cst_10 = arith.constant dense<0.000000e+00> : vector<6x8xf32>
    %14 = tpu.matmul %13, %12, %cst_10 {dimension_numbers = #tpu.dot_dimension_numbers<[1], [0], [0], [1], [0, 0, 1, 1], [], []>} : vector<6x6xf32>, vector<6x8xf32>, vector<6x8xf32> -> vector<6x8xf32>
    %c0_11 = arith.constant 0 : index
    %c0_12 = arith.constant 0 : index
    %15 = vector.load %arg4[%c0_11, %c0_12] : memref<6x1xf32, #tpu.memory_space<vmem>>, vector<6x1xf32>
    %16 = vector.broadcast %15 : vector<6x1xf32> to vector<6x8xf32>
    %17 = arith.addf %14, %16 : vector<6x8xf32>
    %cst_13 = arith.constant 5.000000e-01 : f32
    %18 = vector.broadcast %cst_13 : f32 to vector<6x8xf32>
    %19 = arith.mulf %18, %17 : vector<6x8xf32>
    %20 = math.tanh %19 : vector<6x8xf32>
    %cst_14 = arith.constant 5.000000e-01 : f32
    %21 = vector.broadcast %cst_14 : f32 to vector<6x8xf32>
    %22 = arith.mulf %21, %20 : vector<6x8xf32>
    %cst_15 = arith.constant 5.000000e-01 : f32
    %23 = vector.broadcast %cst_15 : f32 to vector<6x8xf32>
    %24 = arith.addf %22, %23 : vector<6x8xf32>
    %c0_16 = arith.constant 0 : index
    %c0_17 = arith.constant 0 : index
    %25 = vector.load %arg5[%c0_16, %c0_17] : memref<4x6xf32, #tpu.memory_space<vmem>>, vector<4x6xf32>
    %cst_18 = arith.constant dense<0.000000e+00> : vector<4x8xf32>
    %26 = tpu.matmul %25, %24, %cst_18 {dimension_numbers = #tpu.dot_dimension_numbers<[1], [0], [0], [1], [0, 0, 1, 1], [], []>} : vector<4x6xf32>, vector<6x8xf32>, vector<4x8xf32> -> vector<4x8xf32>
    %c0_19 = arith.constant 0 : index
    %c0_20 = arith.constant 0 : index
    %27 = vector.load %arg6[%c0_19, %c0_20] : memref<4x1xf32, #tpu.memory_space<vmem>>, vector<4x1xf32>
    %28 = vector.broadcast %27 : vector<4x1xf32> to vector<4x8xf32>
    %29 = arith.addf %26, %28 : vector<4x8xf32>
    %cst_21 = arith.constant 5.000000e-01 : f32
    %30 = vector.broadcast %cst_21 : f32 to vector<4x8xf32>
    %31 = arith.mulf %30, %29 : vector<4x8xf32>
    %32 = math.tanh %31 : vector<4x8xf32>
    %cst_22 = arith.constant 5.000000e-01 : f32
    %33 = vector.broadcast %cst_22 : f32 to vector<4x8xf32>
    %34 = arith.mulf %33, %32 : vector<4x8xf32>
    %cst_23 = arith.constant 5.000000e-01 : f32
    %35 = vector.broadcast %cst_23 : f32 to vector<4x8xf32>
    %36 = arith.addf %34, %35 : vector<4x8xf32>
    %c0_24 = arith.constant 0 : index
    %c0_25 = arith.constant 0 : index
    %37 = vector.load %arg8[%c0_24, %c0_25] : memref<4x8xf32, #tpu.memory_space<vmem>>, vector<4x8xf32>
    tpu.vector_store %arg8[%c0_24, %c0_25], %36 {strides = array<i32>} : memref<4x8xf32, #tpu.memory_space<vmem>>, vector<4x8xf32>,
    return
  }
  func.func @transform_0(%arg0: i32) -> (i32, i32) {
    %c0_i32 = arith.constant 0 : i32
    %c0_i32_0 = arith.constant 0 : i32
    %c0_i32_1 = arith.constant 0 : i32
    return %c0_i32, %c0_i32_0 : i32, i32
  }
  func.func @transform_1(%arg0: i32) -> (i32, i32) {
    %c0_i32 = arith.constant 0 : i32
    %c0_i32_0 = arith.constant 0 : i32
    %c0_i32_1 = arith.constant 0 : i32
    return %c0_i32, %c0_i32_0 : i32, i32
  }
  func.func @transform_2(%arg0: i32) -> (i32, i32) {
    %c0_i32 = arith.constant 0 : i32
    %c0_i32_0 = arith.constant 0 : i32
    %c0_i32_1 = arith.constant 0 : i32
    return %c0_i32, %c0_i32_0 : i32, i32
  }
  func.func @transform_3(%arg0: i32) -> (i32, i32) {
    %c0_i32 = arith.constant 0 : i32
    %c0_i32_0 = arith.constant 0 : i32
    %c0_i32_1 = arith.constant 0 : i32
    return %c0_i32, %c0_i32_0 : i32, i32
  }
  func.func @transform_4(%arg0: i32) -> (i32, i32) {
    %c0_i32 = arith.constant 0 : i32
    %c0_i32_0 = arith.constant 0 : i32
    %c0_i32_1 = arith.constant 0 : i32
    return %c0_i32, %c0_i32_0 : i32, i32
  }
  func.func @transform_5(%arg0: i32) -> (i32, i32) {
    %c0_i32 = arith.constant 0 : i32
    %c0_i32_0 = arith.constant 0 : i32
    %c0_i32_1 = arith.constant 0 : i32
    return %c0_i32, %c0_i32_0 : i32, i32
  }
  func.func @transform_6(%arg0: i32) -> (i32, i32) {
    %c0_i32 = arith.constant 0 : i32
    %c0_i32_0 = arith.constant 0 : i32
    return %arg0, %c0_i32 : i32, i32
  }
  func.func @transform_7(%arg0: i32) -> (i32, i32) {
    %c0_i32 = arith.constant 0 : i32
    %c0_i32_0 = arith.constant 0 : i32
    return %c0_i32, %arg0 : i32, i32
  }
}

</mosaic_0001>

<bundles_post_ra>
// kernel: tpu_custom_call.1
= control target key start
LH: loop header
LB: loop body
LE: loop exit
PB: predicated region body
PF: predicated region fallthrough
CT: control target
= control target key end

     0   :  { %vm35_vm0 = vcmask 97280   ;;  %v371_v1 = vmov 0.0   ;;  %vm372_vm1 = vmmov 0   ;;  %v373_v4 = vmov 0   ;;  %s457_s0 = inlined_call_operand.vmem [shape: f32[6,12], index: 0, kind: input, shape index: {}]   ;;  %s458_s1 = inlined_call_operand.vmem [shape: f32[6,1], index: 1, kind: input, shape index: {}]   ;;  %s459_s2 = inlined_call_operand.vmem [shape: f32[6,6], index: 2, kind: input, shape index: {}]   ;;  %s460_s3 = inlined_call_operand.vmem [shape: f32[6,1], index: 3, kind: input, shape index: {}]   ;;  %s461_s4 = inlined_call_operand.vmem [shape: f32[4,6], index: 4, kind: input, shape index: {}]   ;;  %s462_s5 = inlined_call_operand.vmem [shape: f32[4,1], index: 5, kind: input, shape index: {}]   ;;  %s463_s6 = inlined_call_operand.vmem [shape: f32[8,12], index: 6, kind: input, shape index: {}]   ;;  %s464_s7 = inlined_call_operand.hbm [shape: f32[4,8], index: 7, kind: output, shape index: {}]  }
   0x1   :  { %v27_v0 = vld [vmem:[%s463_s6] sm:$0xff]  ;;  %320 = vmatprep.subr.mxu0 %v371_v1  ;;  %322 = vmatprep.mubr.msk.f32.mxu0 %vm372_vm1, %v371_v1 }
   0x2   :  { %v29_v2 = vld [vmem:[%s458_s1] sm:$0x3f]  ;;  %321 = vmatpush3.xpose.msk.msra.mxu0 %vm35_vm0, %v27_v0  ;;  %339 = vset.pattern.permute.xlu0 %v373_v4 }
   0x3   :  { %v28_v3 = vld [vmem:[%s457_s0] sm:$0x3f] }
   0x4   :  { %12 = vsyncpa [#allocation3], 0  ;;  %32 = vperm.xlu0 %339, %v29_v2   ;;  %325 = vmatprep.subr.mxu1 %v371_v1  ;;  %v117_v5 = vld [vmem:[%s460_s3] sm:$0x3f]  ;;  %vm127_vm2 = vcmask 1045504   ;;  %vm123_vm3 = vcmask 48128  }
   0x5   :  { %327 = vmatprep.mubr.msk.f32.mxu1 %vm372_vm1, %v371_v1  ;;  %340 = vset.pattern.permute.xlu1 %v373_v4  ;;  %v116_v14 = vld [vmem:[%s459_s2] sm:$0x3f]  ;;  %vm292_vm4 = vcmask 60416  }
   0x6   :  { %323 = vmatmul.mubr.msk.f32.vlgmr.msra.gmra.mrb[0].mxu0 %vm35_vm0, %v28_v3  ;;  %v206_v15 = vld [vmem:[%s462_s5] sm:$0xf]  ;;  %s374_s5 = smov [#allocation2]  }
   0x7   :  { %209 = vperm.xlu1 %340, %v206_v15   ;;  %v205_v24 = vld [vmem:[%s461_s4] sm:$0xf]  ;;  %s300_s10 = sshll.u32 %s374_s5, 4  ;;  %s301_s10 = int_to_ptr.vmem [resolvable:$true] %s300_s10 }
   0x8   :  { %120 = vperm.xlu0 %339, %v117_v5   ;;  %s347_s11 = scalar_lea.vmem %s301_s10, 64  ;;  %p352_p1 = scmp.lt.s32.totalorder %s301_s10, %s301_s10 }
   0x9   :  { %p348_p0 = scmp.ne.s32.totalorder %s301_s10, %s347_s11  ;;  %p353_p2 = scmp.lt.s32.totalorder %s347_s11, %s347_s11 }
   0xb   :  { %p354_p3 = por %p353_p2, %p352_p1 }
   0xd   :  { %p355_p4 = pnand %p354_p3, %p348_p0 }
  0x83   :  { %v33_v6 = vpop.permute.xlu0 %32 }
  0x86   :  { %v210_v25 = vpop.permute.xlu1 %209 }
  0x87   :  { %v121_v16 = vpop.permute.xlu0 %120 }
  0xd9   :  { %v108_v7 = vpop.f32.mrb[0].mxu0 }
  0xda   :  { %v109_v8 = vadd.f32 %v108_v7, %v33_v6  ;;  %v324_v9 = vpop.f32.mrb[1].mxu0 }
  0xdc   :  { %v112_v10 = vmul.f32 0.5, %v109_v8 }
  0xde   :  { %341 = vtanh.f32 %v112_v10 }
  0xe8   :  { %v342_v11 = vpop.eup %341 }
  0xe9   :  { %v114_v12 = vmul.f32 0.5, %v342_v11 }
  0xeb   :  { %v115_v13 = vadd.f32 0.5, %v114_v12 }
  0xed   :  { %326 = vmatpush3.msk.msra.mxu1 %vm127_vm2, %v115_v13 }
  0xee   :  { %328 = vmatmul.mubr.msk.f32.vlgmr.msra.gmra.mrb[0].mxu1 %vm123_vm3, %v116_v14  ;;  %330 = vmatprep.subr.mxu1 %v371_v1 }
  0xef   :  { %332 = vmatprep.mubr.msk.f32.mxu1 %vm372_vm1, %v371_v1 }
 0x1c1   :  { %v197_v17 = vpop.f32.mrb[0].mxu1 }
 0x1c2   :  { %v198_v18 = vadd.f32 %v197_v17, %v121_v16  ;;  %v329_v19 = vpop.f32.mrb[1].mxu1 }
 0x1c4   :  { %v201_v20 = vmul.f32 0.5, %v198_v18 }
 0x1c6   :  { %343 = vtanh.f32 %v201_v20 }
 0x1d0   :  { %v344_v21 = vpop.eup %343 }
 0x1d1   :  { %v203_v22 = vmul.f32 0.5, %v344_v21 }
 0x1d3   :  { %v204_v23 = vadd.f32 0.5, %v203_v22 }
 0x1d5   :  { %331 = vmatpush3.msk.msra.mxu1 %vm127_vm2, %v204_v23 }
 0x1d6   :  { %333 = vmatmul.mubr.msk.f32.vlgmr.msra.gmra.mrb[2].mxu1 %vm123_vm3, %v205_v24 }
 0x2a9   :  { %v284_v26 = vpop.f32.mrb[2].mxu1 }
 0x2aa   :  { %v285_v27 = vadd.f32 %v284_v26, %v210_v25  ;;  %v334_v28 = vpop.f32.mrb[3].mxu1 }
 0x2ac   :  { %v288_v29 = vmul.f32 0.5, %v285_v27 }
 0x2ae   :  { %345 = vtanh.f32 %v288_v29 }
 0x2b8   :  { %v346_v30 = vpop.eup %345 }
 0x2b9   :  { %v290_v31 = vmul.f32 0.5, %v346_v30 }
 0x2bb   :  { %v291_v32 = vadd.f32 0.5, %v290_v31 }
 0x2bd   :  { %293 = vst.msk [vmem:[#allocation2] sm:$0xf] %vm292_vm4, %v291_v32 }
 0x2be   :  { %358 = shalt.err (!%p355_p4)
}
 0x2bf   :  { %s359_s13 = scalar_lea.hbm %s464_s7, 64 }
 0x2c0   :  { %p360_p5 = scmp.ne.s32.totalorder %s464_s7, %s359_s13  ;;  %p363_p6 = scmp.lt.u32.totalorder %s359_s13, %s464_s7 }
 0x2c2   :  { %p365_p7 = pnand %p363_p6, %p360_p5 }
 0x2c4   :  { %368 = shalt.err (!%p365_p7)
}
 0x2c5   :  { %303 = dma.vmem_to_hbm [thread:$0]  %s301_s10, 64, %s464_s7, [#allocation3]  }
 0x2c6   :  { %369 = dma.done.wait [#allocation3], 64  }
 0x2c7   :  { %370 = vsyncadd [#allocation3], 4294967232 }
 0x2c8   :  { %307 = vsyncpa [#allocation3], 1 }

</bundles_post_ra>
